<compile_context>
chip_gen: v5e
topology: v5e:2x2
jax: 0.10.0
libtpu: 0.0.40
codegen_flags: <defaults>
</compile_context>

<pallas_src>
import functools

import jax
import jax.numpy as jnp
from jax.experimental import pallas as pl
from jax.experimental.pallas import tpu as pltpu

_LANE = 128
_SUBLANE = 8
_EPS = 1e-6  # vocos GRN epsilon on the channel mean


def _round_up(n, m):
    return (n + m - 1) // m * m


def _vmem_capacity_bytes():
    """Per-core VMEM capacity, with a conservative (v7x) fallback."""
    try:
        cap = getattr(pltpu.get_tpu_info(), "vmem_capacity_bytes", None)
        if cap:
            return int(cap)
    except Exception:
        pass
    return 64 * 1024 * 1024


# ---------------------------------------------------------------------------
# Fused kernel: one grid step per batch element, one read + one write of x.
# ---------------------------------------------------------------------------
def _grn_fused_kernel(x_ref, gamma_ref, bias_ref, o_ref, *, inv_c, eps):
    # Sum of squares over the sequence (sublane) axis, in f32.
    xf = x_ref[...].astype(jnp.float32)                      # (1, T, C)
    gx = jnp.sqrt(jnp.sum(xf * xf, axis=1, keepdims=True))   # (1, 1, C)
    # Channel mean over the *real* channels only (padded lanes hold zeros).
    gmean = jnp.sum(gx, axis=-1, keepdims=True) * inv_c      # (1, 1, 1)
    inv = pl.reciprocal(gmean + eps, approx=True)            # EUP slot
    # Fold: out = x * (gamma * nx + 1) + bias  -> 1 mul + 1 add per element.
    scale = gamma_ref[...].astype(jnp.float32) * (gx * inv) + 1.0   # (1, 1, C)
    bias = bias_ref[...].astype(jnp.float32)                        # (1, 1, C)
    o_ref[...] = (x_ref[...].astype(jnp.float32) * scale + bias).astype(o_ref.dtype)


# ---------------------------------------------------------------------------
# Two-pass path (large T*C blocks / small VMEM budget).
# Pass 1: T-tiled sum-of-squares reduction -> per-batch (1,1,C) scale vector.
# ---------------------------------------------------------------------------
def _grn_stats_kernel(x_ref, gamma_ref, scale_ref, acc_ref, *, inv_c, eps):
    t = pl.program_id(1)

    @pl.when(t == 0)
    def _():
        acc_ref[...] = jnp.zeros_like(acc_ref)

    xf = x_ref[...].astype(jnp.float32)                      # (1, tT, C)
    acc_ref[...] += jnp.sum(xf * xf, axis=1, keepdims=True)  # (1, 1, C)

    @pl.when(t == pl.num_programs(1) - 1)
    def _():
        gx = jnp.sqrt(acc_ref[...])                          # (1, 1, C)
        gmean = jnp.sum(gx, axis=-1, keepdims=True) * inv_c  # (1, 1, 1)
        inv = pl.reciprocal(gmean + eps, approx=True)
        scale_ref[...] = gamma_ref[...].astype(jnp.float32) * (gx * inv) + 1.0


# Pass 2: fully parallel elementwise apply: out = x * scale + bias.
def _grn_apply_kernel(x_ref, scale_ref, bias_ref, o_ref):
    out = (x_ref[...].astype(jnp.float32) * scale_ref[...]
           + bias_ref[...].astype(jnp.float32))
    o_ref[...] = out.astype(o_ref.dtype)


# ---------------------------------------------------------------------------
# Wrapper
# ---------------------------------------------------------------------------
def grn(x, gamma, bias, *, eps=_EPS, max_block_bytes=None, vmem_limit_bytes=None):
    """x: (B, T, C); gamma, bias: (1, 1, C). Returns (B, T, C)."""
    B, T, C = x.shape
    gamma = gamma.reshape(1, 1, C)
    bias = bias.reshape(1, 1, C)

    cap = _vmem_capacity_bytes()
    if max_block_bytes is None:
        # 2x double-buffered copies of the (1,T,C) block (input + output) plus
        # f32 temps must sit comfortably under the scoped VMEM limit.
        max_block_bytes = max(4 * 1024 * 1024, cap // 16)
    if vmem_limit_bytes is None:
        vmem_limit_bytes = min(cap // 2, 64 * 1024 * 1024)

    itemsize = jnp.dtype(x.dtype).itemsize
    C_pad = _round_up(C, _LANE)                 # lane-dense last dim
    inv_c = 1.0 / float(C)                      # mean over real channels only

    fused = _round_up(T, _SUBLANE) * C_pad * itemsize <= max_block_bytes
    if fused:
        T_pad = _round_up(T, _SUBLANE)
    else:
        tT = max(_SUBLANE,
                 (max_block_bytes // (C_pad * itemsize)) // _SUBLANE * _SUBLANE)
        tT = min(tT, _round_up(T, _SUBLANE))
        T_pad = _round_up(T, tT)

    # Zero-pad: padded seq rows / channel lanes contribute nothing to the
    # reductions and are sliced off the output.
    xp = x if (T_pad == T and C_pad == C) else jnp.pad(
        x, ((0, 0), (0, T_pad - T), (0, C_pad - C)))
    gp = gamma if C_pad == C else jnp.pad(gamma, ((0, 0), (0, 0), (0, C_pad - C)))
    bp = bias if C_pad == C else jnp.pad(bias, ((0, 0), (0, 0), (0, C_pad - C)))

    if fused:
        out = pl.pallas_call(
            functools.partial(_grn_fused_kernel, inv_c=inv_c, eps=eps),
            out_shape=jax.ShapeDtypeStruct((B, T_pad, C_pad), x.dtype),
            grid_spec=pltpu.PrefetchScalarGridSpec(
                num_scalar_prefetch=0,
                grid=(B,),
                in_specs=[
                    pl.BlockSpec((1, T_pad, C_pad), lambda b: (b, 0, 0)),
                    pl.BlockSpec((1, 1, C_pad), lambda b: (0, 0, 0)),
                    pl.BlockSpec((1, 1, C_pad), lambda b: (0, 0, 0)),
                ],
                out_specs=pl.BlockSpec((1, T_pad, C_pad), lambda b: (b, 0, 0)),
            ),
            compiler_params=pltpu.CompilerParams(
                dimension_semantics=("parallel",),
                vmem_limit_bytes=vmem_limit_bytes,
            ),
        )(xp, gp, bp)
    else:
        nT = T_pad // tT
        # Pass 1: per-batch scale vector (f32) from a T-tiled reduction.
        scale = pl.pallas_call(
            functools.partial(_grn_stats_kernel, inv_c=inv_c, eps=eps),
            out_shape=jax.ShapeDtypeStruct((B, 1, C_pad), jnp.float32),
            grid_spec=pltpu.PrefetchScalarGridSpec(
                num_scalar_prefetch=0,
                grid=(B, nT),
                in_specs=[
                    pl.BlockSpec((1, tT, C_pad), lambda b, t: (b, t, 0)),
                    pl.BlockSpec((1, 1, C_pad), lambda b, t: (0, 0, 0)),
                ],
                out_specs=pl.BlockSpec((1, 1, C_pad), lambda b, t: (b, 0, 0)),
                scratch_shapes=[pltpu.VMEM((1, 1, C_pad), jnp.float32)],
            ),
            compiler_params=pltpu.CompilerParams(
                dimension_semantics=("parallel", "arbitrary"),
                vmem_limit_bytes=vmem_limit_bytes,
            ),
        )(xp, gp)
        # Pass 2: fully parallel elementwise apply.
        out = pl.pallas_call(
            _grn_apply_kernel,
            out_shape=jax.ShapeDtypeStruct((B, T_pad, C_pad), x.dtype),
            grid_spec=pltpu.PrefetchScalarGridSpec(
                num_scalar_prefetch=0,
                grid=(B, nT),
                in_specs=[
                    pl.BlockSpec((1, tT, C_pad), lambda b, t: (b, t, 0)),
                    pl.BlockSpec((1, 1, C_pad), lambda b, t: (b, 0, 0)),
                    pl.BlockSpec((1, 1, C_pad), lambda b, t: (0, 0, 0)),
                ],
                out_specs=pl.BlockSpec((1, tT, C_pad), lambda b, t: (b, t, 0)),
            ),
            compiler_params=pltpu.CompilerParams(
                dimension_semantics=("parallel", "parallel"),
                vmem_limit_bytes=vmem_limit_bytes,
            ),
        )(xp, scale, bp)

    if T_pad != T or C_pad != C:
        out = out[:, :T, :C]
    return out


def grn_ref(x, gamma, bias, eps=_EPS):
    """Pure-JAX reference mirroring the PyTorch forward (with vocos eps)."""
    xf = x.astype(jnp.float32)
    gx = jnp.sqrt(jnp.sum(xf * xf, axis=1, keepdims=True))   # norm over dim=1
    nx = gx / (jnp.mean(gx, axis=-1, keepdims=True) + eps)
    return (gamma * (nx * xf) + bias + xf).astype(x.dtype)


if __name__ == "__main__":
    key = jax.random.PRNGKey(0)

    def _check(B, T, C, **kwargs):
        k = jax.random.fold_in(key, B * 10000 + T * 100 + C)
        kx, kg, kb = jax.random.split(k, 3)
        x = jax.random.normal(kx, (B, T, C), dtype=jnp.float32)
        gamma = (jnp.ones((1, 1, C), jnp.float32)
                 + 0.1 * jax.random.normal(kg, (1, 1, C), jnp.float32))
        bias = 0.1 * jax.random.normal(kb, (1, 1, C), jnp.float32)
        out = jax.block_until_ready(grn(x, gamma, bias, **kwargs))
        ref = grn_ref(x, gamma, bias)
        assert out.shape == (B, T, C)
        # Tolerance accommodates the EUP approx reciprocal on the channel mean.
        assert jnp.allclose(out, ref, atol=5e-3, rtol=5e-3), (
            f"mismatch vs reference for (B,T,C)=({B},{T},{C}) kwargs={kwargs}")

    # Fused path; C=32 exercises lane-dense padding to 128.
    _check(2, 8, 32)
    # Fused path; already lane-dense (C = 128).
    _check(2, 16, 128)
    # Force the two-pass T-tiled path (tiny per-step block budget).
    _check(2, 16, 128, max_block_bytes=4096)

    print("KERNEL_OK")
</pallas_src>

<mosaic_0001>
module attributes {stable_mosaic.version = 11 : i64} {
  func.func @_grn_fused_kernel(%arg0: i32, %arg1: memref<1x8x128xf32, #tpu.memory_space<vmem>>, %arg2: memref<1x1x128xf32, #tpu.memory_space<vmem>>, %arg3: memref<1x1x128xf32, #tpu.memory_space<vmem>>, %arg4: memref<1x8x128xf32, #tpu.memory_space<vmem>>) attributes {dimension_semantics = [#tpu.dimension_semantics<parallel>], iteration_bounds = array<i64: 2>, scalar_prefetch = 0 : i64, scratch_operands = 0 : i64, tpu.core_type = #tpu.core_type<tc>, window_params = [{transform_indices = @transform_0, window_bounds = array<i64: 1, 8, 128>}, {pipeline_mode = #tpu.pipeline_mode<synchronous>, transform_indices = @transform_1, window_bounds = array<i64: 1, 1, 128>}, {pipeline_mode = #tpu.pipeline_mode<synchronous>, transform_indices = @transform_2, window_bounds = array<i64: 1, 1, 128>}, {transform_indices = @transform_3, window_bounds = array<i64: 1, 8, 128>}]} {
    %c0 = arith.constant 0 : index
    %c0_0 = arith.constant 0 : index
    %c0_1 = arith.constant 0 : index
    %0 = vector.load %arg1[%c0, %c0_0, %c0_1] : memref<1x8x128xf32, #tpu.memory_space<vmem>>, vector<1x8x128xf32>
    %1 = arith.mulf %0, %0 : vector<1x8x128xf32>
    %cst = arith.constant dense<0.000000e+00> : vector<1x128xf32>
    %2 = vector.multi_reduction <add>, %1, %cst [1] : vector<1x8x128xf32> to vector<1x128xf32>
    %3 = vector.shape_cast %2 : vector<1x128xf32> to vector<1x1x128xf32>
    %4 = math.sqrt %3 : vector<1x1x128xf32>
    %cst_2 = arith.constant dense<0.000000e+00> : vector<1x1xf32>
    %5 = vector.multi_reduction <add>, %4, %cst_2 [2] : vector<1x1x128xf32> to vector<1x1xf32>
    %6 = vector.shape_cast %5 : vector<1x1xf32> to vector<1x1x1xf32>
    %cst_3 = arith.constant 3.125000e-02 : f32
    %7 = vector.broadcast %cst_3 : f32 to vector<1x1x1xf32>
    %8 = arith.mulf %6, %7 : vector<1x1x1xf32>
    %cst_4 = arith.constant 9.99999997E-7 : f32
    %9 = vector.broadcast %cst_4 : f32 to vector<1x1x1xf32>
    %10 = arith.addf %8, %9 : vector<1x1x1xf32>
    %11 = tpu.reciprocal %10 {approx = true} : vector<1x1x1xf32> -> vector<1x1x1xf32>
    %c0_5 = arith.constant 0 : index
    %c0_6 = arith.constant 0 : index
    %c0_7 = arith.constant 0 : index
    %12 = vector.load %arg2[%c0_5, %c0_6, %c0_7] : memref<1x1x128xf32, #tpu.memory_space<vmem>>, vector<1x1x128xf32>
    %13 = vector.broadcast %11 : vector<1x1x1xf32> to vector<1x1x128xf32>
    %14 = arith.mulf %4, %13 : vector<1x1x128xf32>
    %15 = arith.mulf %12, %14 : vector<1x1x128xf32>
    %cst_8 = arith.constant 1.000000e+00 : f32
    %16 = vector.broadcast %cst_8 : f32 to vector<1x1x128xf32>
    %17 = arith.addf %15, %16 : vector<1x1x128xf32>
    %c0_9 = arith.constant 0 : index
    %c0_10 = arith.constant 0 : index
    %c0_11 = arith.constant 0 : index
    %18 = vector.load %arg3[%c0_9, %c0_10, %c0_11] : memref<1x1x128xf32, #tpu.memory_space<vmem>>, vector<1x1x128xf32>
    %c0_12 = arith.constant 0 : index
    %c0_13 = arith.constant 0 : index
    %c0_14 = arith.constant 0 : index
    %19 = vector.load %arg1[%c0_12, %c0_13, %c0_14] : memref<1x8x128xf32, #tpu.memory_space<vmem>>, vector<1x8x128xf32>
    %20 = vector.broadcast %17 : vector<1x1x128xf32> to vector<1x8x128xf32>
    %21 = arith.mulf %19, %20 : vector<1x8x128xf32>
    %22 = vector.broadcast %18 : vector<1x1x128xf32> to vector<1x8x128xf32>
    %23 = arith.addf %21, %22 : vector<1x8x128xf32>
    %c0_15 = arith.constant 0 : index
    %c0_16 = arith.constant 0 : index
    %c0_17 = arith.constant 0 : index
    %24 = vector.load %arg4[%c0_15, %c0_16, %c0_17] : memref<1x8x128xf32, #tpu.memory_space<vmem>>, vector<1x8x128xf32>
    tpu.vector_store %arg4[%c0_15, %c0_16, %c0_17], %23 {strides = array<i32>} : memref<1x8x128xf32, #tpu.memory_space<vmem>>, vector<1x8x128xf32>,
    return
  }
  func.func @transform_0(%arg0: i32) -> (i32, i32, i32) {
    %c0_i32 = arith.constant 0 : i32
    %c0_i32_0 = arith.constant 0 : i32
    %c0_i32_1 = arith.constant 0 : i32
    return %arg0, %c0_i32, %c0_i32_0 : i32, i32, i32
  }
  func.func @transform_1(%arg0: i32) -> (i32, i32, i32) {
    %c0_i32 = arith.constant 0 : i32
    %c0_i32_0 = arith.constant 0 : i32
    %c0_i32_1 = arith.constant 0 : i32
    %c0_i32_2 = arith.constant 0 : i32
    return %c0_i32, %c0_i32_0, %c0_i32_1 : i32, i32, i32
  }
  func.func @transform_2(%arg0: i32) -> (i32, i32, i32) {
    %c0_i32 = arith.constant 0 : i32
    %c0_i32_0 = arith.constant 0 : i32
    %c0_i32_1 = arith.constant 0 : i32
    %c0_i32_2 = arith.constant 0 : i32
    return %c0_i32, %c0_i32_0, %c0_i32_1 : i32, i32, i32
  }
  func.func @transform_3(%arg0: i32) -> (i32, i32, i32) {
    %c0_i32 = arith.constant 0 : i32
    %c0_i32_0 = arith.constant 0 : i32
    %c0_i32_1 = arith.constant 0 : i32
    return %arg0, %c0_i32, %c0_i32_0 : i32, i32, i32
  }
}

</mosaic_0001>

<bundles_post_ra>
// kernel: tpu_custom_call.1
= control target key start
LH: loop header
LB: loop body
LE: loop exit
PB: predicated region body
PF: predicated region fallthrough
CT: control target
= control target key end

     0   :  { %8 = vsyncpa [#allocation3], 0  ;;  %s712_s0 = inlined_call_operand.hbm [shape: f32[2,8,128], index: 0, kind: input, shape index: {}]   ;;  %s713_s1 = inlined_call_operand.hbm [shape: f32[1,1,128], index: 1, kind: input, shape index: {}]   ;;  %s714_s2 = inlined_call_operand.vmem [shape: f32[1,1,128], index: 2, kind: input, shape index: {}]   ;;  %s715_s3 = inlined_call_operand.hbm [shape: f32[2,8,128], index: 3, kind: output, shape index: {}]  }
   0x1   :  { %10 = vsyncpa [#allocation3 + $0x1], 0 }
   0x2   :  { %11 = vsyncpa [#allocation6], 0 }
   0x3   :  { %12 = vsyncpa [#allocation4], 0 }
   0x4   :  { %14 = vsyncpa [#allocation4 + $0x1], 0  ;;  %s567_s12 = smov 0   ;;  %s569_s13 = smov 0  }
   0x5   :  { %s571_s14 = smov 0   ;;  %s573_s15 = smov 0  }
   0x6 LB: > { %s588_s16 = sadd.s32 4294967295, %s544_s15   ;;  %s338_s17 = sadd.s32 4294967294, %s544_s15   ;;  %s544_s15 = sphi %s573_s15, %s725_s15   ;;  %s540_s14 = sphi %s571_s14, %s724_s14   ;;  %s536_s13 = sphi %s569_s13, %s723_s13   ;;  %s532_s12 = sphi %s567_s12, %s722_s12  }
   0x7   : > { %p40_p0 = scmp.ne.s32.totalorder %s536_s13, %s532_s12  ;;  %p41_p1 = scmp.eq.s32.totalorder %s588_s16, 0 }
   0x8   : > { %p106_p2 = scmp.eq.s32.totalorder %s588_s16, 1  ;;  %p112_p3 = scmp.eq.s32.totalorder %s338_s17, 1 }
   0x9   : > { %p597_p4 = por %p41_p1, %p40_p0  ;;  %p339_p5 = scmp.ge.s32.totalorder %s544_s15, 1 }
   0xa   : > { %p602_p6 = por %p112_p3, %p40_p0  ;;  %p119_p7 = scmp.lt.s32.totalorder %s544_s15, 3 }
   0xb   : > { %s131_s22 = sshll.u32 %s713_s1, 4  ;;  %s546_s24 = smov [#allocation5]   ;;  %s132_s22 = int_to_ptr.hbm [resolvable:$true] %s131_s22 }
   0xc   : > { %p610_p8 = pnand %p339_p5, %p119_p7  ;;  %s133_s25 = sshll.u32 %s546_s24, 4  ;;  %s134_s25 = int_to_ptr.vmem [resolvable:$true] %s133_s25 }
   0xd   : > { %s620_s26 = sadd.s32 1, %s544_s15   ;;  %s27_s27 = sadd.s32 1, %s540_s14 }
   0xe   : > { %p360_p10 = pneg %p610_p8  ;;  %s24_s28 = ssub.s32 %s544_s15, %s620_s26 }
   0xf   : > { %p25_p12 = scmp.eq.s32.totalorder %s24_s28, 0  ;;  %p34_p13 = scmp.ne.s32.totalorder %s540_s14, %s536_s13 }
  0x10   : > { %p361_p11 = pnand %p360_p10, %p41_p1  ;;  %p35_p0 = scmp.eq.s32.totalorder %s544_s15, 0 }
  0x11   : > { %s629_s29 = scalar_select %p25_p12, %s540_s14, %s27_s27  }
  0x12   : > { %363 = dma.hbm_to_vmem [thread:$0]  (!%p361_p11), %s132_s22, 16, %s134_s25, [#allocation6]  }
  0x13   : > { %p633_p3 = por %p106_p2, %p34_p13  ;;  %p373_p5 = scmp.lt.s32.totalorder %s544_s15, 2 }
  0x14   : > { %s147_s4 = sand.u32 1, %s540_s14   ;;  %s343_s5 = sshll.u32 %s544_s15, 3 }
  0x15   : > { %p36_p7 = por %p35_p0, %p34_p13  ;;  %s342_s6 = sshll.u32 %s147_s4, 3 }
  0x16   : > { %s155_s9 = scalar_lea.hbm %s712_s0, %s343_s5  ;;  %s151_s11 = scalar_lea.vmem [#allocation2], %s342_s6 }
  0x17   : > { %s157_s10 = sshll.u32 %s155_s9, 4  ;;  %s159_s17 = sshll.u32 %s151_s11, 4  ;;  %s158_s10 = int_to_ptr.hbm [resolvable:$true] %s157_s10  ;;  %s160_s17 = int_to_ptr.vmem [resolvable:$true] %s159_s17 }
  0x18   : > { %p643_p10 = pnand %p373_p5, %p36_p7  ;;  %s148_s21 = scalar_lea.sflag [#allocation3], %s147_s4 }
  0x19   : > { %s444_s22 = sshra.s32 %s158_s10, 4  ;;  %s451_s28 = scalar_lea.hbm %s712_s0, 16  ;;  %s445_s22 = int_to_ptr.hbm [resolvable:$true] %s444_s22 }
  0x1a   : > { %s446_s24 = scalar_lea.hbm %s445_s22, 8  ;;  %p448_p11 = pneg %p643_p10 }
  0x1b   : > { %p447_p2 = scmp.ne.s32.totalorder %s445_s22, %s446_s24  ;;  %p452_p0 = scmp.lt.s32.totalorder %s445_s22, %s712_s0 }
  0x1c   : > { %p453_p5 = scmp.lt.s32.totalorder %s451_s28, %s446_s24 }
  0x1d   : > { %p449_p12 = pnand %p448_p11, %p447_p2 }
  0x1e   : > { %p454_p7 = por %p453_p5, %p452_p0 }
  0x1f   : > { %p450_p13 = pneg %p449_p12 }
  0x21   : > { %p455_p9 = pnand %p454_p7, %p450_p13 }
  0x23   : > { %458 = shalt.err (!%p455_p9)
}
  0x24   : > { %367 = dma.hbm_to_vmem [thread:$0]  (!%p643_p10), %s158_s10, 128, %s160_s17, %s148_s21  }
  0x25   : > { %168 = sbr.rel (%p610_p8) target bundleno = 223 (0xdf), region = 32  ;;  %s660_s4 = sand.u32 (!%p610_p8), 1, %s536_s13  }
  0x26   : > { %s345_s7 = sshll.u32 (!%p610_p8), %s660_s4, 3  ;;  %s171_s8 = scalar_lea.sflag (!%p610_p8), [#allocation3], %s660_s4 }
  0x27   : > { %s174_s9 = scalar_lea.vmem (!%p610_p8), [#allocation2], %s345_s7 }
  0x2a   : > { %519 = dma.done.wait (%p597_p4), %s171_s8, 128  }
  0x2b   : > { %521 = vsyncadd (%p597_p4), %s171_s8, 4294967168 }
  0x2c   : > { %523 = dma.done.wait (%p41_p1), [#allocation6], 16  }
  0x2d   : > { %525 = vsyncadd (%p41_p1), [#allocation6], 4294967280  ;;  %v203_v0 = vld [vmem:[%s174_s9] sm:$0xff]  ;;  %v228_v22 = vld [vmem:[#allocation5] sm:$0x1]  ;;  %s349_s18 = sshll.u32 %s588_s16, 3 }
  0x2e   : > { %v204_v1 = vmul.f32 %v203_v0, %v203_v0  ;;  %s253_s11 = scalar_lea.hbm %s715_s3, %s349_s18  ;;  %v409_v27 = vld [vmem:[%s714_s2] ss:$0 sm:$0xff]  ;;  %s202_s21 = scalar_lea.vmem [#allocation7], %s345_s7 }
  0x2f   : > { %s255_s22 = sshll.u32 %s202_s21, 4  ;;  %s257_s24 = sshll.u32 %s253_s11, 4  ;;  %s256_s22 = int_to_ptr.vmem [resolvable:$true] %s255_s22  ;;  %s258_s24 = int_to_ptr.hbm [resolvable:$true] %s257_s24 }
  0x30   : > { %v205_v2 = vrot.slane %v204_v1, 4  ;;  %s243_s16 = scalar_lea.sflag [#allocation4], %s660_s4  ;;  %s488_s25 = sshra.s32 %s258_s24, 4  ;;  %s489_s25 = int_to_ptr.hbm [resolvable:$true] %s488_s25 }
  0x31   : > { %s490_s27 = scalar_lea.hbm %s489_s25, 8  ;;  %s494_s6 = scalar_lea.hbm %s715_s3, 16 }
  0x32   : > { %v206_v3 = vadd.f32 %v205_v2, %v204_v1  ;;  %p491_p1 = scmp.ne.s32.totalorder %s489_s25, %s490_s27  ;;  %p495_p9 = scmp.lt.s32.totalorder %s489_s25, %s715_s3 }
  0x33   : > { %p496_p10 = scmp.lt.s32.totalorder %s494_s6, %s490_s27 }
  0x34   : > { %v207_v4 = vrot.slane %v206_v3, 2  ;;  %p492_p4 = pnand %p491_p1, %p633_p3 }
  0x35   : > { %p497_p2 = por %p496_p10, %p495_p9 }
  0x36   : > { %v208_v5 = vadd.f32 %v207_v4, %v206_v3  ;;  %p493_p8 = pneg %p492_p4 }
  0x38   : > { %v209_v6 = vrot.slane %v208_v5, 1  ;;  %p498_p11 = pnand %p497_p2, %p493_p8 }
  0x3a   : > { %v210_v7 = vadd.f32 %v209_v6, %v208_v5 }
  0x3c   : > { %410 = vrsqrt.f32 %v210_v7  ;;  %vm218_vm0 = vcmp.eq.f32.partialorder %v210_v7, inf  ;;  %v221_v14 = vand.u32 2147483648, %v210_v7  ;;  %vm220_vm1 = vcmp.eq.f32.partialorder %v210_v7, 0.0 }
  0x42   : > { %v411_v8 = vpop.eup %410 }
  0x43   : > { %v212_v9 = vmul.f32 %v411_v8, %v210_v7 }
  0x45   : > { %v213_v10 = vmul.f32 %v411_v8, %v212_v9 }
  0x47   : > { %v214_v11 = vmul.f32 0.5, %v213_v10 }
  0x49   : > { %v215_v12 = vsub.f32 1.5, %v214_v11 }
  0x4b   : > { %v216_v13 = vmul.f32 %v411_v8, %v215_v12 }
  0x4d   : > { %v217_v15 = vmul.f32 %v216_v13, %v210_v7 }
  0x4f   : > { %v219_v16 = vsel %vm218_vm0, %v210_v7, %v217_v15 }
  0x50   : > { %v222_v17 = vsel %vm220_vm1, %v221_v14, %v219_v16 }
  0x51   : > { %223 = vadd.xlane.f32.xlu0 %v222_v17 }
  0xc4   : > { %v224_v18 = vpop.xlane.xlu0 %223 }
  0xc5   : > { %v225_v19 = vmul.f32 0.03125, %v224_v18 }
  0xc7   : > { %v226_v20 = vadd.f32 1e-06, %v225_v19 }
  0xc9   : > { %412 = vrcp.f32 %v226_v20 }
  0xcf   : > { %v413_v21 = vpop.eup %412 }
  0xd0   : > { %v229_v23 = vmul.f32 %v413_v21, %v222_v17 }
  0xd2   : > { %v230_v24 = vmul.f32 %v229_v23, %v228_v22 }
  0xd4   : > { %v231_v25 = vadd.f32 1.0, %v230_v24 }
  0xd6   : > { %v234_v26 = vperm.slane %v231_v25, 0 }
  0xd8   : > { %v236_v28 = vmul.f32 %v234_v26, %v203_v0 }
  0xda   : > { %v240_v29 = vadd.f32 %v409_v27, %v236_v28 }
  0xdc   : > { %241 = vst [vmem:[%s202_s21] sm:$0xff] %v240_v29 }
  0xdd   : > { %501 = shalt.err (!%p498_p11)
}
  0xde   : > { %358 = dma.vmem_to_hbm [thread:$0]  (%p633_p3), %s256_s22, 128, %s258_s24, %s243_s16  }
  0xdf PF: > { %s269_s4 = sand.u32 1, %s532_s12   ;;  %p721_p12 = scmp.ge.s32.totalorder %s544_s15, 2 }
  0xe0   : > { %s270_s9 = scalar_lea.sflag [#allocation4], %s269_s4 }
  0xe1   : > { %p369_p13 = pnand %p721_p12, %p602_p6 }
  0xe3   : > { %p370_p0 = pneg %p369_p13 }
  0xe5   : > { %527 = dma.done.wait (%p370_p0), %s270_s9, 128  }
  0xe6   : > { %529 = vsyncadd (%p370_p0), %s270_s9, 4294967168  ;;  %p17_p5 = scmp.ge.s32.totalorder %s620_s26, 4   ;;  %s722_s12 = smov %s536_s13 }
  0xe7   : > { %s723_s13 = smov %s540_s14  ;;  %s724_s14 = smov %s629_s29 }
  0xe8   : > { %s725_s15 = smov %s620_s26  ;;  %19 = sbr.rel (!%p17_p5) target bundleno = 6 (0x6), region = 81 }
  0xed   :  { %276 = vsyncpa [#allocation3], 1 }
  0xee   :  { %278 = vsyncpa [#allocation3 + $0x1], 1 }
  0xef   :  { %279 = vsyncpa [#allocation6], 1 }
  0xf0   :  { %280 = vsyncpa [#allocation4], 1 }
  0xf1   :  { %282 = vsyncpa [#allocation4 + $0x1], 1 }

</bundles_post_ra>
